<compile_context>
chip_gen: v7x
topology: tpu7x:2x2x1
jax: 0.10.0
libtpu: 0.0.40
codegen_flags: <defaults>
</compile_context>

<pallas_src>
import functools

import jax
import jax.numpy as jnp
from jax.experimental import pallas as pl
from jax.experimental.pallas import tpu as pltpu


def _make_kernel(batch):
    """Kernel specialized on the static batch size (statically unrolled)."""

    def kernel(x_ref, wb_ref, bounds_ref, o_ref):
        # x_ref:      VMEM (IN+1, B)   -- input columns with a trailing 1.0 row
        # wb_ref:     VMEM (IN+1, OUT) -- W^T with bias appended as last row
        # bounds_ref: SMEM (2,)        -- [min_value, max_value] runtime scalars
        # o_ref:      VMEM (B, OUT)
        wb = wb_ref[...]                      # (IN+1, OUT), one vreg at this size
        lo = bounds_ref[0]
        hi = bounds_ref[1]
        for bi in range(batch):               # static unroll (batch == 1 here)
            x_col = x_ref[:, bi : bi + 1]     # (IN+1, 1) column (includes 1.0)
            # broadcast-multiply (VPU) + single sublane reduce (XLU);
            # the 1.0 row folds the bias add into the same reduce.
            acc = jnp.sum(x_col * wb, axis=0, keepdims=True)   # (1, OUT) f32
            # clamp_min -> clamp_max  ==  min(max(x, lo), hi)  ==  jnp.clip
            o_ref[bi : bi + 1, :] = jnp.clip(acc, lo, hi).astype(o_ref.dtype)

    return kernel


@jax.jit
def linear_clamp(x, wb, min_value, max_value):
    """x: (B, IN) f32, wb: (IN+1, OUT) f32 (W^T with bias row), bounds runtime."""
    B, IN = x.shape
    IN1, OUT = wb.shape
    assert IN1 == IN + 1

    # Append a 1.0 row so the bias row of wb is picked up by the same reduce.
    x_aug = jnp.concatenate(
        [x.astype(jnp.float32).T, jnp.ones((1, B), jnp.float32)], axis=0
    )  # (IN+1, B)
    bounds = jnp.stack(
        [jnp.asarray(min_value, jnp.float32), jnp.asarray(max_value, jnp.float32)]
    )  # (2,) runtime scalars -> SMEM

    kernel = _make_kernel(B)
    return pl.pallas_call(
        kernel,
        out_shape=jax.ShapeDtypeStruct((B, OUT), jnp.float32),
        in_specs=[
            pl.BlockSpec((IN1, B), lambda: (0, 0)),     # x columns (VMEM)
            pl.BlockSpec((IN1, OUT), lambda: (0, 0)),   # fused W^T + bias (VMEM)
            pl.BlockSpec(memory_space=pltpu.SMEM),      # [min, max] scalars
        ],
        out_specs=pl.BlockSpec((B, OUT), lambda: (0, 0)),
    )(x_aug, wb.astype(jnp.float32), bounds)


if __name__ == "__main__":
    key = jax.random.PRNGKey(0)
    k_x, k_w, k_b = jax.random.split(key, 3)

    IN, OUT, B = 3, 8, 1
    min_value, max_value = 0.2, 0.8

    # Deterministic parameter init (matches nn.Linear's uniform(-1/sqrt(in), 1/sqrt(in)) range).
    bound = 1.0 / jnp.sqrt(jnp.float32(IN))
    w = jax.random.uniform(k_w, (OUT, IN), jnp.float32, -bound, bound)  # torch layout (out, in)
    b = jax.random.uniform(k_b, (OUT,), jnp.float32, -bound, bound)
    x1 = jax.random.normal(k_x, (B, IN), jnp.float32)

    # One-time parameter prep: fold bias into the weight tile -> (IN+1, OUT).
    wb = jnp.concatenate([w.T, b.reshape(1, OUT)], axis=0)

    out = linear_clamp(x1, wb, min_value, max_value)
    out = jax.block_until_ready(out)

    # Reference check in plain JAX (same clamp_min -> clamp_max order).
    ref = jnp.minimum(jnp.maximum(x1 @ w.T + b, min_value), max_value)
    assert out.shape == (B, OUT)
    assert jnp.allclose(out, ref, atol=1e-5, rtol=1e-5)
    print("KERNEL_OK")
</pallas_src>

<mosaic_0001>
module attributes {stable_mosaic.version = 11 : i64} {
  func.func @kernel(%arg0: memref<4x1xf32, #tpu.memory_space<vmem>>, %arg1: memref<4x8xf32, #tpu.memory_space<vmem>>, %arg2: memref<2xf32, #tpu.memory_space<smem>>, %arg3: memref<1x8xf32, #tpu.memory_space<vmem>>) attributes {dimension_semantics = [], scalar_prefetch = 0 : i64, scratch_operands = 0 : i64, tpu.core_type = #tpu.core_type<tc>} {
    %c0 = arith.constant 0 : index
    %c0_0 = arith.constant 0 : index
    %0 = vector.load %arg1[%c0, %c0_0] : memref<4x8xf32, #tpu.memory_space<vmem>>, vector<4x8xf32>
    %c0_1 = arith.constant 0 : index
    %1 = memref.load %arg2[%c0_1] : memref<2xf32, #tpu.memory_space<smem>>
    %c1 = arith.constant 1 : index
    %2 = memref.load %arg2[%c1] : memref<2xf32, #tpu.memory_space<smem>>
    %c0_2 = arith.constant 0 : index
    %c0_3 = arith.constant 0 : index
    %3 = vector.load %arg0[%c0_2, %c0_3] : memref<4x1xf32, #tpu.memory_space<vmem>>, vector<4x1xf32>
    %4 = vector.broadcast %3 : vector<4x1xf32> to vector<4x8xf32>
    %5 = arith.mulf %4, %0 : vector<4x8xf32>
    %cst = arith.constant dense<0.000000e+00> : vector<8xf32>
    %6 = vector.multi_reduction <add>, %5, %cst [0] : vector<4x8xf32> to vector<8xf32>
    %7 = vector.shape_cast %6 : vector<8xf32> to vector<1x8xf32>
    %8 = vector.broadcast %1 : f32 to vector<1x8xf32>
    %9 = arith.maximumf %8, %7 : vector<1x8xf32>
    %10 = vector.broadcast %2 : f32 to vector<1x8xf32>
    %11 = arith.minimumf %10, %9 : vector<1x8xf32>
    %c0_4 = arith.constant 0 : index
    %c0_5 = arith.constant 0 : index
    %12 = vector.load %arg3[%c0_4, %c0_5] : memref<1x8xf32, #tpu.memory_space<vmem>>, vector<1x8xf32>
    tpu.vector_store %arg3[%c0_4, %c0_5], %11 {strides = array<i32>} : memref<1x8xf32, #tpu.memory_space<vmem>>, vector<1x8xf32>,
    return
  }
}

</mosaic_0001>

<bundles_post_ra>
// kernel: linear_clamp.1
= control target key start
LH: loop header
LB: loop body
LE: loop exit
PB: predicated region body
PF: predicated region fallthrough
CT: control target
= control target key end

     0   :  { %8 = vsyncpa [#allocation4], 0  ;;  %s154_s0 = inlined_call_operand.vmem [shape: f32[4,1], index: 0, kind: input, shape index: {}]   ;;  %s155_s1 = inlined_call_operand.vmem [shape: f32[4,8], index: 1, kind: input, shape index: {}]   ;;  %s156_s2 = inlined_call_operand.vmem [shape: f32[2], index: 2, kind: input, shape index: {}]   ;;  %s157_s3 = inlined_call_operand.hbm [shape: f32[1,8], index: 3, kind: output, shape index: {}]  }
   0x1   :  { %9 = vsyncpa [#allocation3], 0  ;;  %s20_s14 = sshll.u32 %s156_s2, 4  ;;  %s21_s14 = int_to_ptr.vmem [resolvable:$true] %s20_s14 }
   0x2   :  { %s72_s15 = scalar_lea.vmem %s21_s14, 16  ;;  %p77_p1 = scmp.lt.s32.totalorder %s21_s14, %s21_s14 }
   0x3   :  { %p73_p0 = scmp.ne.s32.totalorder %s21_s14, %s72_s15  ;;  %p78_p2 = scmp.lt.s32.totalorder %s72_s15, %s72_s15 }
   0x5   :  { %p79_p3 = por %p78_p2, %p77_p1 }
   0x7   :  { %p80_p4 = pnand %p79_p3, %p73_p0 }
   0x9   :  { %83 = shalt.err (!%p80_p4)
}
   0xa   :  { %s110_s16 = smov [#allocation2]  }
   0xb   :  { %23 = dma.vmem_to_smem %s21_s14, 16, %s110_s16, [#allocation4]  }
   0xc   :  { %106 = dma.done.wait [#allocation4], 16  }
   0xd   :  { %107 = vsyncadd [#allocation4], 4294967280 }
   0xe   :  { %27 = sfence }
   0xf   :  { %v31_v0 = vld [vmem:[%s154_s0] sm:$0xf]  ;;  %v111_v1 = vmov 0   ;;  %vm38_vm0 = vcmask 60416   ;;  %s29_s20 = sld [smem:[#allocation2]]  ;;  %s67_s21 = sld [smem:[#allocation2 + $0x1]] }
  0x10   :  { %71 = vset.pattern.permute.xlu0 %v111_v1  ;;  %v28_v2 = vld [vmem:[%s155_s1] sm:$0xf]  ;;  %s112_s0 = smov [#allocation5]   ;;  %vm50_vm1 = vcmask 57344  }
  0x11   :  { %34 = vperm.xlu0 %71, %v31_v0   ;;  %s58_s22 = sshll.u32 %s112_s0, 4  ;;  %s59_s22 = int_to_ptr.vmem [resolvable:$true] %s58_s22 }
  0x12   :  { %s84_s1 = scalar_lea.vmem %s59_s22, 16  ;;  %s88_s23 = scalar_lea.vmem %s59_s22, 32 }
  0x13   :  { %p85_p5 = scmp.ne.s32.totalorder %s59_s22, %s84_s1  ;;  %p89_p6 = scmp.lt.s32.totalorder %s59_s22, %s59_s22 }
  0x14   :  { %p90_p7 = scmp.lt.s32.totalorder %s88_s23, %s84_s1 }
  0x15   :  { %v46_v11 = vstv %s29_s20  ;;  %v48_v13 = vstv %s67_s21 }
  0x16   :  { %p91_p8 = por %p90_p7, %p89_p6 }
  0x18   :  { %p92_p9 = pnand %p91_p8, %p85_p5 }
  0x90   :  { %v35_v3 = vpop.permute.xlu0 %34 }
  0x91   :  { %v37_v4 = vmul.f32 %v35_v3, %v28_v2 }
  0x93   :  { %v39_v5 = vsel %vm38_vm0, %v37_v4, 0.0 }
  0x94   :  { %v40_v6 = vrot.slane %v39_v5, 4 }
  0x96   :  { %v41_v7 = vadd.f32 %v40_v6, %v39_v5 }
  0x98   :  { %v42_v8 = vrot.slane %v41_v7, 2 }
  0x9a   :  { %v43_v9 = vadd.f32 %v42_v8, %v41_v7 }
  0x9c   :  { %v44_v10 = vrot.slane %v43_v9, 1 }
  0x9e   :  { %v45_v12 = vadd.f32 %v44_v10, %v43_v9 }
  0xa0   :  { %v47_v14 = vmax.f32 %v46_v11, %v45_v12 }
  0xa2   :  { %v49_v15 = vmin.f32 %v48_v13, %v47_v14 }
  0xa4   :  { %51 = vst.msk [vmem:[#allocation5] sm:$0x1] %vm50_vm1, %v49_v15 }
  0xa5   :  { %95 = shalt.err (!%p92_p9)
}
  0xa6   :  { %s96_s26 = scalar_lea.hbm %s157_s3, 16 }
  0xa7   :  { %p97_p10 = scmp.ne.s32.totalorder %s157_s3, %s96_s26  ;;  %p100_p11 = scmp.lt.u32.totalorder %s96_s26, %s157_s3 }
  0xa9   :  { %p102_p12 = pnand %p100_p11, %p97_p10 }
  0xab   :  { %105 = shalt.err (!%p102_p12)
}
  0xac   :  { %61 = dma.vmem_to_hbm [thread:$0]  %s59_s22, 16, %s157_s3, [#allocation3]  }
  0xad   :  { %108 = dma.done.wait [#allocation3], 16  }
  0xae   :  { %109 = vsyncadd [#allocation3], 4294967280 }
  0xaf   :  { %65 = vsyncpa [#allocation3], 1 }
  0xb0   :  { %66 = vsyncpa [#allocation4], 1 }

</bundles_post_ra>
